<compile_context>
chip_gen: v7x
topology: tpu7x:2x2x1
jax: 0.10.0
libtpu: 0.0.40
codegen_flags: <defaults>
</compile_context>

<pallas_src>
import jax
import jax.numpy as jnp
from jax.experimental import pallas as pl
from jax.experimental.pallas import tpu as pltpu


def _make_scaling_kernel(channels: int, use_shift: bool):
    """Builds the fused SiLU -> 1x1-conv -> x*(1+scale)+shift kernel."""

    def kernel(x_ref, cond_ref, w_ref, b_ref, o_ref):
        # conditions tile: (cond_ch, tile_t); SiLU applied to conditions
        c = cond_ref[0].astype(jnp.float32)
        c = c * jax.nn.sigmoid(c)
        # kernel_size=1 Conv1d == channel matmul on the MXU:
        # (out_ch, cond_ch) @ (cond_ch, tile_t) -> (out_ch, tile_t)
        w = w_ref[...].astype(jnp.float32)
        proj = jnp.dot(w, c, preferred_element_type=jnp.float32)
        proj = proj + b_ref[...].astype(jnp.float32)          # bias (out_ch, 1)

        x = x_ref[0].astype(jnp.float32)                      # (channels, tile_t)
        y = x * (1.0 + proj[:channels, :])                    # scales = first chunk
        if use_shift:
            y = y + proj[channels:, :]                        # shifts = second chunk
        o_ref[0] = y.astype(o_ref.dtype)

    return kernel


def _pick_tile_t(T: int, cap: int = 2048) -> int:
    """Largest multiple of 128 that divides T (capped); else the full extent."""
    if T % 128 != 0:
        return T            # full-dim block: no (8,128) constraint, no padding
    best = 128
    t = 128
    while t <= min(T, cap):
        if T % t == 0:
            best = t
        t += 128
    return best


def scaling_forward(x, conditions, weight, bias, *, use_shift: bool = True,
                    tile_t: int | None = None):
    """Pallas implementation of Scaling.forward(x, conditions).

    x:          (B, channels, T)
    conditions: (B, condition_channels, T)
    weight:     Conv1d weight, (out_ch, condition_channels[, 1]) with
                out_ch = channels * (1 + use_shift)
    bias:       (out_ch,)
    """
    B, C, T = x.shape
    Bc, C_cond, Tc = conditions.shape
    assert (B, T) == (Bc, Tc), "x / conditions batch & time dims must match"
    out_ch = C * (1 + int(use_shift))

    if weight.ndim == 3:                       # Conv1d weight (out_ch, in_ch, 1)
        weight = weight[:, :, 0]
    assert weight.shape == (out_ch, C_cond)
    bias2d = bias.reshape(out_ch, 1)

    if tile_t is None:
        tile_t = _pick_tile_t(T)
    assert T % tile_t == 0
    grid = (B, T // tile_t)

    kernel = _make_scaling_kernel(C, use_shift)

    return pl.pallas_call(
        kernel,
        out_shape=jax.ShapeDtypeStruct((B, C, T), x.dtype),
        grid_spec=pltpu.PrefetchScalarGridSpec(
            num_scalar_prefetch=0,
            grid=grid,
            in_specs=[
                pl.BlockSpec((1, C, tile_t), lambda b, t: (b, 0, t)),        # x
                pl.BlockSpec((1, C_cond, tile_t), lambda b, t: (b, 0, t)),   # conditions
                pl.BlockSpec((out_ch, C_cond), lambda b, t: (0, 0)),         # conv weight
                pl.BlockSpec((out_ch, 1), lambda b, t: (0, 0)),              # conv bias
            ],
            out_specs=pl.BlockSpec((1, C, tile_t), lambda b, t: (b, 0, t)),
        ),
        compiler_params=pltpu.CompilerParams(
            dimension_semantics=("parallel", "parallel"),
        ),
    )(x, conditions, weight, bias2d)


def _scaling_ref(x, cond, weight, bias, use_shift):
    """Plain-JAX reference matching the PyTorch module."""
    c = cond * jax.nn.sigmoid(cond)                         # SiLU
    p = jnp.einsum("oc,bct->bot", weight, c) + bias[None, :, None]
    C = x.shape[1]
    scales = p[:, :C]
    shifts = p[:, C:] if use_shift else jnp.zeros_like(scales)
    return x * (1.0 + scales) + shifts


if __name__ == "__main__":
    key = jax.random.PRNGKey(0)
    B, C, C_cond, T = 2, 16, 32, 256
    k1, k2, k3, k4 = jax.random.split(key, 4)

    x = jax.random.normal(k1, (B, C, T), dtype=jnp.float32)
    cond = jax.random.normal(k2, (B, C_cond, T), dtype=jnp.float32)

    # --- case 1: spec default init (Conv_Init 'zero') -> output must equal x ---
    out_ch = C * 2
    w_zero = jnp.zeros((out_ch, C_cond), dtype=jnp.float32)
    b_zero = jnp.zeros((out_ch,), dtype=jnp.float32)
    out0 = jax.block_until_ready(
        scaling_forward(x, cond, w_zero, b_zero, use_shift=True))
    assert jnp.allclose(out0, x, atol=1e-6), "zero-init Scaling must be identity"

    # --- case 2: random weights, use_shift=True ---
    w = 0.05 * jax.random.normal(k3, (out_ch, C_cond), dtype=jnp.float32)
    b = 0.05 * jax.random.normal(k4, (out_ch,), dtype=jnp.float32)
    out1 = jax.block_until_ready(scaling_forward(x, cond, w, b, use_shift=True))
    ref1 = _scaling_ref(x, cond, w, b, True)
    assert out1.shape == x.shape and out1.dtype == x.dtype
    assert jnp.allclose(out1, ref1, atol=1e-5, rtol=1e-5), "mismatch (use_shift=True)"

    # --- case 3: random weights, use_shift=False ---
    w2 = w[:C]
    b2 = b[:C]
    out2 = jax.block_until_ready(scaling_forward(x, cond, w2, b2, use_shift=False))
    ref2 = _scaling_ref(x, cond, w2, b2, False)
    assert jnp.allclose(out2, ref2, atol=1e-5, rtol=1e-5), "mismatch (use_shift=False)"

    print("KERNEL_OK")
</pallas_src>

<mosaic_0001>
module attributes {stable_mosaic.version = 11 : i64} {
  func.func @kernel(%arg0: i32, %arg1: i32, %arg2: memref<1x16x256xf32, #tpu.memory_space<vmem>>, %arg3: memref<1x32x256xf32, #tpu.memory_space<vmem>>, %arg4: memref<32x32xf32, #tpu.memory_space<vmem>>, %arg5: memref<32x1xf32, #tpu.memory_space<vmem>>, %arg6: memref<1x16x256xf32, #tpu.memory_space<vmem>>) attributes {dimension_semantics = [#tpu.dimension_semantics<parallel>, #tpu.dimension_semantics<parallel>], iteration_bounds = array<i64: 2, 1>, scalar_prefetch = 0 : i64, scratch_operands = 0 : i64, tpu.core_type = #tpu.core_type<tc>, window_params = [{transform_indices = @transform_0, window_bounds = array<i64: 1, 16, 256>}, {transform_indices = @transform_1, window_bounds = array<i64: 1, 32, 256>}, {pipeline_mode = #tpu.pipeline_mode<synchronous>, transform_indices = @transform_2, window_bounds = array<i64: 32, 32>}, {pipeline_mode = #tpu.pipeline_mode<synchronous>, transform_indices = @transform_3, window_bounds = array<i64: 32, 1>}, {transform_indices = @transform_4, window_bounds = array<i64: 1, 16, 256>}]} {
    %c0 = arith.constant 0 : index
    %c0_0 = arith.constant 0 : index
    %c0_1 = arith.constant 0 : index
    %0 = vector.load %arg3[%c0, %c0_0, %c0_1] : memref<1x32x256xf32, #tpu.memory_space<vmem>>, vector<1x32x256xf32>
    %1 = vector.shape_cast %0 : vector<1x32x256xf32> to vector<32x256xf32>
    %2 = arith.negf %1 : vector<32x256xf32>
    %3 = math.exp %2 : vector<32x256xf32>
    %cst = arith.constant 1.000000e+00 : f32
    %4 = vector.broadcast %cst : f32 to vector<32x256xf32>
    %5 = arith.addf %4, %3 : vector<32x256xf32>
    %6 = arith.divf %4, %5 : vector<32x256xf32>
    %7 = arith.mulf %1, %6 : vector<32x256xf32>
    %c0_2 = arith.constant 0 : index
    %c0_3 = arith.constant 0 : index
    %8 = vector.load %arg4[%c0_2, %c0_3] : memref<32x32xf32, #tpu.memory_space<vmem>>, vector<32x32xf32>
    %cst_4 = arith.constant dense<0.000000e+00> : vector<32x256xf32>
    %9 = tpu.matmul %8, %7, %cst_4 {dimension_numbers = #tpu.dot_dimension_numbers<[1], [0], [0], [1], [0, 0, 1, 1], [], []>} : vector<32x32xf32>, vector<32x256xf32>, vector<32x256xf32> -> vector<32x256xf32>
    %c0_5 = arith.constant 0 : index
    %c0_6 = arith.constant 0 : index
    %10 = vector.load %arg5[%c0_5, %c0_6] : memref<32x1xf32, #tpu.memory_space<vmem>>, vector<32x1xf32>
    %11 = vector.broadcast %10 : vector<32x1xf32> to vector<32x256xf32>
    %12 = arith.addf %9, %11 : vector<32x256xf32>
    %c0_7 = arith.constant 0 : index
    %c0_8 = arith.constant 0 : index
    %c0_9 = arith.constant 0 : index
    %13 = vector.load %arg2[%c0_7, %c0_8, %c0_9] : memref<1x16x256xf32, #tpu.memory_space<vmem>>, vector<1x16x256xf32>
    %14 = vector.shape_cast %13 : vector<1x16x256xf32> to vector<16x256xf32>
    %15 = vector.extract_strided_slice %12 {offsets = [0, 0], sizes = [16, 256], strides = [1, 1]} : vector<32x256xf32> to vector<16x256xf32>
    %cst_10 = arith.constant 1.000000e+00 : f32
    %16 = vector.broadcast %cst_10 : f32 to vector<16x256xf32>
    %17 = arith.addf %16, %15 : vector<16x256xf32>
    %18 = arith.mulf %14, %17 : vector<16x256xf32>
    %19 = vector.extract_strided_slice %12 {offsets = [16, 0], sizes = [16, 256], strides = [1, 1]} : vector<32x256xf32> to vector<16x256xf32>
    %20 = arith.addf %18, %19 : vector<16x256xf32>
    %c0_11 = arith.constant 0 : index
    %c0_12 = arith.constant 0 : index
    %c0_13 = arith.constant 0 : index
    %21 = vector.load %arg6[%c0_11, %c0_12, %c0_13] : memref<1x16x256xf32, #tpu.memory_space<vmem>>, vector<1x16x256xf32>
    %22 = vector.shape_cast %21 : vector<1x16x256xf32> to vector<16x256xf32>
    %23 = vector.shape_cast %20 : vector<16x256xf32> to vector<1x16x256xf32>
    tpu.vector_store %arg6[%c0_11, %c0_12, %c0_13], %23 {strides = array<i32>} : memref<1x16x256xf32, #tpu.memory_space<vmem>>, vector<1x16x256xf32>,
    return
  }
  func.func @transform_0(%arg0: i32, %arg1: i32) -> (i32, i32, i32) {
    %c0_i32 = arith.constant 0 : i32
    %c0_i32_0 = arith.constant 0 : i32
    return %arg0, %c0_i32, %arg1 : i32, i32, i32
  }
  func.func @transform_1(%arg0: i32, %arg1: i32) -> (i32, i32, i32) {
    %c0_i32 = arith.constant 0 : i32
    %c0_i32_0 = arith.constant 0 : i32
    return %arg0, %c0_i32, %arg1 : i32, i32, i32
  }
  func.func @transform_2(%arg0: i32, %arg1: i32) -> (i32, i32) {
    %c0_i32 = arith.constant 0 : i32
    %c0_i32_0 = arith.constant 0 : i32
    %c0_i32_1 = arith.constant 0 : i32
    return %c0_i32, %c0_i32_0 : i32, i32
  }
  func.func @transform_3(%arg0: i32, %arg1: i32) -> (i32, i32) {
    %c0_i32 = arith.constant 0 : i32
    %c0_i32_0 = arith.constant 0 : i32
    %c0_i32_1 = arith.constant 0 : i32
    return %c0_i32, %c0_i32_0 : i32, i32
  }
  func.func @transform_4(%arg0: i32, %arg1: i32) -> (i32, i32, i32) {
    %c0_i32 = arith.constant 0 : i32
    %c0_i32_0 = arith.constant 0 : i32
    return %arg0, %c0_i32, %arg1 : i32, i32, i32
  }
}

</mosaic_0001>

<bundles_post_ra>
// kernel: tpu_custom_call.1
= control target key start
LH: loop header
LB: loop body
LE: loop exit
PB: predicated region body
PF: predicated region fallthrough
CT: control target
= control target key end

     0   :  { %9 = vsyncpa [#allocation3], 0  ;;  %s1240_s0 = inlined_call_operand.hbm [shape: f32[2,16,256], index: 0, kind: input, shape index: {}]   ;;  %s1241_s1 = inlined_call_operand.hbm [shape: f32[2,32,256], index: 1, kind: input, shape index: {}]   ;;  %s1242_s2 = inlined_call_operand.vmem [shape: f32[32,32], index: 2, kind: input, shape index: {}]   ;;  %s1243_s3 = inlined_call_operand.vmem [shape: f32[32,1], index: 3, kind: input, shape index: {}]   ;;  %s1244_s4 = inlined_call_operand.hbm [shape: f32[2,16,256], index: 4, kind: output, shape index: {}]  }
   0x1   :  { %11 = vsyncpa [#allocation3 + $0x1], 0 }
   0x2   :  { %12 = vsyncpa [#allocation6], 0 }
   0x3   :  { %14 = vsyncpa [#allocation6 + $0x1], 0 }
   0x4   :  { %15 = vsyncpa [#allocation4], 0 }
   0x5   :  { %17 = vsyncpa [#allocation4 + $0x1], 0  ;;  %s959_s15 = smov 0   ;;  %s961_s16 = smov 0  }
   0x6   :  { %s963_s17 = smov 0   ;;  %s965_s18 = smov 0  }
   0x7   :  { %s967_s19 = smov 0   ;;  %s969_s20 = smov 0  }
   0x8 LB: > { %s624_s21 = sadd.s32 4294967295, %s923_s20   ;;  %s625_s22 = sadd.s32 4294967294, %s923_s20   ;;  %s923_s20 = sphi %s969_s20, %s23_s20   ;;  %s919_s19 = sphi %s967_s19, %s1264_s19   ;;  %s915_s18 = sphi %s965_s18, %s1263_s18   ;;  %s911_s17 = sphi %s963_s17, %s1262_s17   ;;  %s907_s16 = sphi %s961_s16, %s1261_s16   ;;  %s903_s15 = sphi %s959_s15, %s1260_s15  }
   0x9   : > { %s35_s23 = sadd.s32 1, %s919_s19  ;;  %s44_s24 = sadd.s32 1, %s911_s17 }
   0xa   : > { %p37_p0 = scmp.ge.s32.totalorder %s35_s23, 2  ;;  %p51_p1 = scmp.ne.s32.totalorder %s911_s17, %s907_s16 }
   0xb   : > { %p52_p2 = scmp.eq.s32.totalorder %s923_s20, 0  ;;  %p57_p3 = scmp.ne.s32.totalorder %s907_s16, %s903_s15 }
   0xc   : > { %s1266_s23 = smov (%p37_p0, %s35_s23), 0  ;;  %p58_p5 = scmp.eq.s32.totalorder %s624_s21, 0 }
   0xd   : > { %p1000_p4 = por %p52_p2, %p51_p1  ;;  %s39_s26 = ssub.s32 %s919_s19, %s1266_s23 }
   0xe   : > { %p153_p6 = scmp.eq.s32.totalorder %s624_s21, 1  ;;  %p42_p7 = scmp.eq.s32.totalorder %s39_s26, 0 }
   0xf   : > { %p1006_p8 = por %p58_p5, %p57_p3  ;;  %p159_p10 = scmp.eq.s32.totalorder %s625_s22, 1 }
  0x10   : > { %p1010_p9 = por %p153_p6, %p51_p1  ;;  %p687_p13 = scmp.lt.s32.totalorder %s923_s20, 2 }
  0x11   : > { %s1249_s27 = scalar_select %p1006_p8, 1, 0 }
  0x12   : > { %s1250_s28 = scalar_select %p1010_p9, 1, 0 }
  0x13   : > { %s1015_s29 = scalar_select %p42_p7, %s911_s17, %s44_s24  }
  0x14   : > { %p1017_p11 = por %p159_p10, %p57_p3  ;;  %s1024_s5 = sand.u32 1, %s911_s17  }
  0x15   : > { %s628_s6 = sshll.u32 %s1024_s5, 5  ;;  %s655_s7 = sshll.u32 %s919_s19, 9 }
  0x16   : > { %s1251_s30 = scalar_select %p1017_p11, 1, 0 }
  0x17   : > { %s1031_s10 = scalar_lea.hbm %s1240_s0, %s655_s7  ;;  %s189_s11 = scalar_lea.vmem [#allocation2], %s628_s6 }
  0x18   : > { %s198_s12 = sshll.u32 %s189_s11, 4  ;;  %p1037_p0 = pnand %p687_p13, %p1000_p4  ;;  %s1033_s12 = int_to_ptr.vmem [resolvable:$true] %s198_s12 }
  0x19   : > { %s186_s14 = scalar_lea.sflag [#allocation3], %s1024_s5  ;;  %s777_s21 = scalar_lea.hbm %s1031_s10, 512 }
  0x1a   : > { %p778_p2 = scmp.ne.s32.totalorder %s1031_s10, %s777_s21  ;;  %p779_p3 = pneg %p1037_p0 }
  0x1b   : > { %s782_s25 = scalar_lea.hbm %s1240_s0, 1024  ;;  %p783_p4 = scmp.lt.u32.totalorder %s1031_s10, %s1240_s0 }
  0x1c   : > { %p780_p5 = pnand %p779_p3, %p778_p2  ;;  %p784_p7 = scmp.lt.u32.totalorder %s782_s25, %s777_s21 }
  0x1d   : > { %p786_p13 = scmp.lt.u32.totalorder %s777_s21, %s1031_s10 }
  0x1e   : > { %p781_p6 = pneg %p780_p5  ;;  %p785_p10 = por %p784_p7, %p783_p4 }
  0x20   : > { %p787_p12 = por %p786_p13, %p785_p10 }
  0x22   : > { %p788_p1 = pnand %p787_p12, %p781_p6 }
  0x24   : > { %791 = shalt.err (!%p788_p1)
}
  0x25   : > { %s792_s7 = scalar_lea.vmem %s1033_s12, 512  ;;  %s925_s8 = smov [#allocation2]  }
  0x26   : > { %p793_p2 = scmp.ne.s32.totalorder %s1033_s12, %s792_s7  ;;  %s797_s9 = sshll.u32 %s925_s8, 4  ;;  %s798_s9 = int_to_ptr.vmem [resolvable:$false] %s797_s9 }
  0x27   : > { %s799_s11 = scalar_lea.vmem %s798_s9, 1024  ;;  %p800_p9 = scmp.lt.s32.totalorder %s1033_s12, %s798_s9 }
  0x28   : > { %p795_p5 = pnand %p793_p2, %p779_p3  ;;  %p801_p4 = scmp.lt.s32.totalorder %s799_s11, %s792_s7 }
  0x2a   : > { %p796_p11 = pneg %p795_p5  ;;  %p802_p7 = por %p801_p4, %p800_p9 }
  0x2c   : > { %p803_p10 = pnand %p802_p7, %p796_p11 }
  0x2e   : > { %806 = shalt.err (!%p803_p10)
}
  0x2f   : > { %s1246_s21 = smov 256   ;;  %s927_s22 = smov 16  }
  0x30   : > { %679 = dma.hbm_to_vmem [thread:$0]  (!%p1037_p0), %s1031_s10, 512, %s1033_s12, %s186_s14, %s1246_s21, %s1246_s21, %s927_s22  }
  0x31   : > { %p229_p9 = scmp.lt.s32.totalorder %s923_s20, 3  ;;  %s631_s24 = sshll.u32 %s1024_s5, 6 }
  0x32   : > { %s656_s25 = sshll.u32 %s919_s19, 10  ;;  %p1253_p11 = scmp.ge.s32.totalorder %s923_s20, 1 }
  0x33   : > { %s1085_s8 = scalar_lea.hbm %s1241_s1, %s656_s25  ;;  %s212_s9 = scalar_lea.vmem [#allocation5], %s631_s24 }
  0x34   : > { %p1078_p12 = pnand %p1253_p11, %p229_p9  ;;  %s221_s11 = sshll.u32 %s212_s9, 4  ;;  %s1087_s11 = int_to_ptr.vmem [resolvable:$true] %s221_s11 }
  0x35   : > { %s209_s10 = scalar_lea.sflag [#allocation6], %s1024_s5  ;;  %s807_s12 = scalar_lea.hbm %s1085_s8, 1024 }
  0x36   : > { %p808_p1 = scmp.ne.s32.totalorder %s1085_s8, %s807_s12  ;;  %s812_s25 = scalar_lea.hbm %s1241_s1, 2048 }
  0x37   : > { %p813_p2 = scmp.lt.u32.totalorder %s1085_s8, %s1241_s1  ;;  %p814_p5 = scmp.lt.u32.totalorder %s812_s25, %s807_s12 }
  0x38   : > { %p810_p6 = pnand %p808_p1, %p779_p3  ;;  %p816_p7 = scmp.lt.u32.totalorder %s807_s12, %s1085_s8 }
  0x39   : > { %p815_p4 = por %p814_p5, %p813_p2 }
  0x3a   : > { %p811_p13 = pneg %p810_p6 }
  0x3b   : > { %p817_p10 = por %p816_p7, %p815_p4 }
  0x3d   : > { %p818_p9 = pnand %p817_p10, %p811_p13 }
  0x3f   : > { %821 = shalt.err (!%p818_p9)
}
  0x40   : > { %s822_s24 = scalar_lea.vmem %s1087_s11, 1024  ;;  %s928_s21 = smov [#allocation5]  }
  0x41   : > { %p823_p11 = scmp.ne.s32.totalorder %s1087_s11, %s822_s24  ;;  %s827_s9 = sshll.u32 %s928_s21, 4  ;;  %s828_s9 = int_to_ptr.vmem [resolvable:$false] %s827_s9 }
  0x42   : > { %s829_s14 = scalar_lea.vmem %s828_s9, 2048  ;;  %p830_p8 = scmp.lt.s32.totalorder %s1087_s11, %s828_s9 }
  0x43   : > { %p825_p1 = pnand %p823_p11, %p779_p3  ;;  %p831_p2 = scmp.lt.s32.totalorder %s829_s14, %s822_s24 }
  0x45   : > { %p826_p6 = pneg %p825_p1  ;;  %p832_p5 = por %p831_p2, %p830_p8 }
  0x47   : > { %p833_p4 = pnand %p832_p5, %p826_p6 }
  0x49   : > { %836 = shalt.err (!%p833_p4)
}
  0x4a   : > { %s1255_s12 = smov 256   ;;  %233 = sbr.rel (%p1078_p12) target bundleno = 366 (0x16e), region = 36 }
  0x4b   : > { %682 = dma.hbm_to_vmem [thread:$0]  (!%p1037_p0), %s1085_s8, 1024, %s1087_s11, %s209_s10, %s1255_s12, %s1255_s12, %s927_s22  }
  0x4c   : > { %s1121_s25 = sand.u32 (!%p1078_p12), 1, %s907_s16   ;;  %p1256_p8 = scmp.ne.s32.totalorder (!%p1078_p12), %s1249_s27, 0 }
  0x4d   : > { %s635_s6 = sshll.u32 (!%p1078_p12), %s1121_s25, 5  ;;  %s236_s13 = scalar_lea.sflag (!%p1078_p12), [#allocation3], %s1121_s25 }
  0x4e   : > { %s1127_s7 = scalar_lea.vmem (!%p1078_p12), [#allocation2], %s635_s6 }
  0x51   : > { %890 = dma.done.wait (%p1256_p8), %s236_s13, 512  }
  0x52   : > { %892 = vsyncadd (%p1256_p8), %s236_s13, 4294966784  ;;  %s636_s5 = sshll.u32 %s1121_s25, 6  ;;  %s245_s22 = scalar_lea.sflag [#allocation6], %s1121_s25 }
  0x53   : > { %s248_s26 = scalar_lea.vmem [#allocation5], %s636_s5 }
  0x54   : > { %894 = dma.done.wait (%p1256_p8), %s245_s22, 1024  }
  0x55   : > { %896 = vsyncadd (%p1256_p8), %s245_s22, 4294966272  ;;  %v929_v0 = vmov 0.0   ;;  %v930_v1 = vmov 0   ;;  %v282_v2 = vld [vmem:[%s248_s26 + $0x8] sm:$0xff]  ;;  %v284_v3 = vld [vmem:[%s248_s26 + $0x18] sm:$0xff]  ;;  %vm373_vm0 = vcmask 261120  }
  0x56   : > { %450 = vmatprep.mubr.f32.mxu0 %v929_v0  ;;  %462 = vmatprep.mubr.f32.mxu1 %v929_v0  ;;  %v281_v4 = vld [vmem:[%s248_s26] sm:$0xff]  ;;  %v639_v5 = vmul.f32 -1.442695, %v282_v2  ;;  %v641_v6 = vmul.f32 -1.442695, %v284_v3  ;;  %v283_v7 = vld [vmem:[%s248_s26 + $0x10] sm:$0xff] }
  0x57   : > { %743 = vset.pattern.permute.xlu0 %v930_v1  ;;  %744 = vset.pattern.permute.xlu1 %v930_v1  ;;  %v286_v8 = vld [vmem:[%s248_s26 + $0x28] sm:$0xff]  ;;  %v638_v9 = vmul.f32 -1.442695, %v281_v4  ;;  %v640_v10 = vmul.f32 -1.442695, %v283_v7  ;;  %v1141_v11 = vld [vmem:[%s248_s26 + $0x38] sm:$0xff] }
  0x58   : > { %v1143_v12 = vld [vmem:[%s248_s26 + $0x20] sm:$0xff]  ;;  %745 = vpow2.f32 %v639_v5  ;;  %v643_v13 = vmul.f32 -1.442695, %v286_v8  ;;  %v1145_v14 = vld [vmem:[%s248_s26 + $0x30] sm:$0xff]  ;;  %v645_v15 = vmul.f32 -1.442695, %v1141_v11 }
  0x59   : > { %747 = vpow2.f32 %v641_v6  ;;  %v642_v16 = vmul.f32 -1.442695, %v1143_v12  ;;  %v349_v17 = vld [vmem:[%s1243_s3] sm:$0xff]  ;;  %v351_v18 = vld [vmem:[%s1243_s3 + $0x10] sm:$0xff]  ;;  %v644_v19 = vmul.f32 -1.442695, %v1145_v14 }
  0x5a   : > { %749 = vpow2.f32 %v638_v9  ;;  %355 = vperm.xlu0 %743, %v349_v17   ;;  %365 = vperm.xlu1 %744, %v351_v18   ;;  %v350_v20 = vld [vmem:[%s1243_s3 + $0x8] sm:$0xff]  ;;  %v352_v21 = vld [vmem:[%s1243_s3 + $0x18] sm:$0xff]  ;;  %v345_v58 = vld [vmem:[%s1242_s2] sm:$0xff]  ;;  %s277_s10 = scalar_lea.vmem [#allocation7], %s635_s6  ;;  %s657_s21 = sshll.u32 %s915_s18, 9 }
  0x5b   : > { %751 = vpow2.f32 %v640_v10  ;;  %v347_v59 = vld [vmem:[%s1242_s2 + $0x10] sm:$0xff]  ;;  %v346_v60 = vld [vmem:[%s1242_s2 + $0x8] sm:$0xff]  ;;  %v348_v61 = vld [vmem:[%s1242_s2 + $0x18] sm:$0xff]  ;;  %s511_s24 = sshll.u32 %s277_s10, 4  ;;  %s496_s18 = scalar_lea.sflag [#allocation4], %s1121_s25  ;;  %s1186_s24 = int_to_ptr.vmem [resolvable:$true] %s511_s24 }
  0x5c   : > { %753 = vpow2.f32 %v643_v13  ;;  %v476_v9 = vld [vmem:[%s1127_s7 + $0x8] sm:$0xff]  ;;  %s837_s14 = scalar_lea.vmem %s1186_s24, 512  ;;  %p1257_p3 = scmp.ne.s32.totalorder %s1250_s28, 0 }
  0x5d   : > { %755 = vpow2.f32 %v645_v15  ;;  %p838_p0 = scmp.ne.s32.totalorder %s1186_s24, %s837_s14  ;;  %s931_s12 = smov [#allocation7]  }
  0x5e   : > { %757 = vpow2.f32 %v642_v16  ;;  %360 = vperm.xlu0 %743, %v350_v20   ;;  %370 = vperm.xlu1 %744, %v352_v21   ;;  %v477_v20 = vld [vmem:[%s1127_s7 + $0x10] sm:$0xff]  ;;  %s841_s13 = sshll.u32 %s931_s12, 4  ;;  %s842_s13 = int_to_ptr.vmem [resolvable:$false] %s841_s13 }
  0x5f   : > { %759 = vpow2.f32 %v644_v19  ;;  %p839_p12 = pnand %p838_p0, %p1257_p3  ;;  %s843_s5 = scalar_lea.vmem %s842_s13, 1024 }
  0x60   : > { %p844_p7 = scmp.lt.s32.totalorder %s1186_s24, %s842_s13  ;;  %p845_p10 = scmp.lt.s32.totalorder %s843_s5, %s837_s14 }
  0x61   : > { %p840_p13 = pneg %p839_p12 }
  0x62   : > { %v746_v22 = vpop.eup %745  ;;  %p846_p9 = por %p845_p10, %p844_p7 }
  0x63   : > { %v748_v23 = vpop.eup %747  ;;  %v314_v24 = vadd.f32 1.0, %v746_v22 }
  0x64   : > { %v750_v25 = vpop.eup %749  ;;  %v316_v26 = vadd.f32 1.0, %v748_v23  ;;  %p847_p11 = pnand %p846_p9, %p840_p13 }
  0x65   : > { %v752_v27 = vpop.eup %751  ;;  %761 = vrcp.f32 %v314_v24  ;;  %v313_v28 = vadd.f32 1.0, %v750_v25  ;;  %v478_v25 = vld [vmem:[%s1127_s7 + $0x18] sm:$0xff] }
  0x66   : > { %v754_v29 = vpop.eup %753  ;;  %763 = vrcp.f32 %v316_v26  ;;  %v315_v30 = vadd.f32 1.0, %v752_v27 }
  0x67   : > { %v756_v31 = vpop.eup %755  ;;  %765 = vrcp.f32 %v313_v28  ;;  %v318_v32 = vadd.f32 1.0, %v754_v29 }
  0x68   : > { %v758_v33 = vpop.eup %757  ;;  %767 = vrcp.f32 %v315_v30  ;;  %v320_v34 = vadd.f32 1.0, %v756_v31 }
  0x69   : > { %v760_v35 = vpop.eup %759  ;;  %769 = vrcp.f32 %v318_v32  ;;  %v317_v36 = vadd.f32 1.0, %v758_v33 }
  0x6a   : > { %771 = vrcp.f32 %v320_v34  ;;  %v319_v37 = vadd.f32 1.0, %v760_v35 }
  0x6b   : > { %773 = vrcp.f32 %v317_v36 }
  0x6c   : > { %775 = vrcp.f32 %v319_v37 }
  0x6f   : > { %v762_v38 = vpop.eup %761 }
  0x70   : > { %v764_v39 = vpop.eup %763  ;;  %v338_v40 = vmul.f32 %v762_v38, %v282_v2 }
  0x71   : > { %v766_v41 = vpop.eup %765  ;;  %v340_v42 = vmul.f32 %v764_v39, %v284_v3 }
  0x72   : > { %v768_v43 = vpop.eup %767  ;;  %v337_v44 = vmul.f32 %v766_v41, %v281_v4 }
  0x73   : > { %v770_v45 = vpop.eup %769  ;;  %v658_v46 = vpack.c.bf16 %v340_v42, %v338_v40  ;;  %v339_v47 = vmul.f32 %v768_v43, %v283_v7 }
  0x74   : > { %v772_v48 = vpop.eup %771  ;;  %v342_v49 = vmul.f32 %v770_v45, %v286_v8 }
  0x75   : > { %v774_v50 = vpop.eup %773  ;;  %659 = vmatprep.subr.bf16.mxu0 %v658_v46  ;;  %666 = vmatprep.subr.bf16.mxu1 %v658_v46  ;;  %v660_v51 = vpack.c.bf16 %v339_v47, %v337_v44  ;;  %v344_v52 = vmul.f32 %v772_v48, %v1141_v11 }
  0x76   : > { %v776_v53 = vpop.eup %775  ;;  %v341_v54 = vmul.f32 %v774_v50, %v1143_v12 }
  0x77   : > { %661 = vmatpush1.bf16.msra.mxu0 %v660_v51  ;;  %668 = vmatpush1.bf16.msra.mxu1 %v660_v51  ;;  %v662_v55 = vpack.c.bf16 %v344_v52, %v342_v49  ;;  %v343_v56 = vmul.f32 %v776_v53, %v1145_v14 }
  0x79   : > { %663 = vmatprep.subr.bf16.mxu0 %v662_v55  ;;  %667 = vmatprep.subr.bf16.mxu1 %v662_v55  ;;  %v664_v57 = vpack.c.bf16 %v343_v56, %v341_v54 }
  0x7b   : > { %665 = vmatpush1.bf16.msra.mxu0 %v664_v57  ;;  %669 = vmatpush1.bf16.msra.mxu1 %v664_v57 }
  0x7e   : > { %646 = vmatmul.mubr.msk.f32.vlgmr.msra.gmra.mrb[0].mxu0 %vm373_vm0, %v345_v58  ;;  %648 = vmatmul.mubr.msk.f32.vlgmr.msra.gmra.mrb[0].mxu1 %vm373_vm0, %v347_v59 }
  0x7f   : > { %456 = vmatprep.mubr.f32.mxu0 %v929_v0  ;;  %468 = vmatprep.mubr.f32.mxu1 %v929_v0  ;;  %v475_v0 = vld [vmem:[%s1127_s7] sm:$0xff]  ;;  %s1191_s7 = scalar_lea.hbm %s1244_s4, %s657_s21 }
  0x82   : > { %647 = vmatmul.mubr.msk.f32.gmra.mrb[2].mxu0 %vm373_vm0, %v346_v60  ;;  %649 = vmatmul.mubr.msk.f32.gmra.mrb[2].mxu1 %vm373_vm0, %v348_v61 }
  0xd9   : > { %v356_v62 = vpop.permute.xlu0 %355  ;;  %v366_v63 = vpop.permute.xlu1 %365 }
  0xdd   : > { %v361_v8 = vpop.permute.xlu0 %360  ;;  %v371_v21 = vpop.permute.xlu1 %370 }
 0x151   : > { %v452_v1 = vpop.f32.mrb[0].mxu0  ;;  %v464_v2 = vpop.f32.mrb[0].mxu1 }
 0x152   : > { %v453_v3 = vadd.f32 %v452_v1, %v356_v62  ;;  %v454_v4 = vpop.f32.mrb[1].mxu0  ;;  %v466_v5 = vpop.f32.mrb[1].mxu1  ;;  %v465_v10 = vadd.f32 %v464_v2, %v366_v63 }
 0x153   : > { %v455_v6 = vadd.f32 %v454_v4, %v356_v62  ;;  %v467_v12 = vadd.f32 %v466_v5, %v366_v63 }
 0x154   : > { %v479_v7 = vadd.f32 1.0, %v453_v3 }
 0x155   : > { %v480_v11 = vadd.f32 1.0, %v455_v6  ;;  %v458_v13 = vpop.f32.mrb[2].mxu0  ;;  %v470_v14 = vpop.f32.mrb[2].mxu1 }
 0x156   : > { %v483_v15 = vmul.f32 %v479_v7, %v475_v0  ;;  %v459_v16 = vadd.f32 %v458_v13, %v361_v8  ;;  %v460_v17 = vpop.f32.mrb[3].mxu0  ;;  %v472_v18 = vpop.f32.mrb[3].mxu1  ;;  %v471_v29 = vadd.f32 %v470_v14, %v371_v21 }
 0x157   : > { %v484_v19 = vmul.f32 %v480_v11, %v476_v9  ;;  %v461_v22 = vadd.f32 %v460_v17, %v361_v8  ;;  %v473_v31 = vadd.f32 %v472_v18, %v371_v21 }
 0x158   : > { %v487_v23 = vadd.f32 %v483_v15, %v465_v10  ;;  %v481_v24 = vadd.f32 1.0, %v459_v16 }
 0x159   : > { %v488_v26 = vadd.f32 %v484_v19, %v467_v12  ;;  %v482_v27 = vadd.f32 1.0, %v461_v22 }
 0x15a   : > { %491 = vst [vmem:[%s277_s10] sm:$0xff] %v487_v23  ;;  %v485_v28 = vmul.f32 %v481_v24, %v477_v20 }
 0x15b   : > { %492 = vst [vmem:[%s277_s10 + $0x8] sm:$0xff] %v488_v26  ;;  %v486_v30 = vmul.f32 %v482_v27, %v478_v25 }
 0x15c   : > { %v489_v32 = vadd.f32 %v485_v28, %v471_v29 }
 0x15d   : > { %v490_v33 = vadd.f32 %v486_v30, %v473_v31 }
 0x15e   : > { %493 = vst [vmem:[%s277_s10 + $0x10] sm:$0xff] %v489_v32 }
 0x15f   : > { %494 = vst [vmem:[%s277_s10 + $0x18] sm:$0xff] %v490_v33 }
 0x160   : > { %850 = shalt.err (!%p847_p11)
}
 0x161   : > { %s851_s22 = scalar_lea.hbm %s1191_s7, 512  ;;  %s855_s8 = scalar_lea.hbm %s1244_s4, 1024 }
 0x162   : > { %p852_p1 = scmp.ne.s32.totalorder %s1191_s7, %s851_s22  ;;  %p856_p5 = scmp.lt.u32.totalorder %s1191_s7, %s1244_s4 }
 0x163   : > { %p857_p4 = scmp.lt.u32.totalorder %s855_s8, %s851_s22  ;;  %p859_p0 = scmp.lt.u32.totalorder %s851_s22, %s1191_s7 }
 0x164   : > { %p853_p6 = pnand %p852_p1, %p1257_p3 }
 0x165   : > { %p858_p8 = por %p857_p4, %p856_p5 }
 0x166   : > { %p854_p2 = pneg %p853_p6 }
 0x167   : > { %p860_p12 = por %p859_p0, %p858_p8 }
 0x169   : > { %p861_p13 = pnand %p860_p12, %p854_p2 }
 0x16b   : > { %864 = shalt.err (!%p861_p13)
}
 0x16c   : > { %s932_s21 = smov 256   ;;  %s933_s6 = smov 16  }
 0x16d   : > { %674 = dma.vmem_to_hbm [thread:$0]  (%p1257_p3), %s1186_s24, 512, %s1191_s7, %s496_s18, %s932_s21, %s932_s21, %s933_s6  }
 0x16e PF: > { %s526_s9 = sand.u32 1, %s903_s15   ;;  %p1258_p7 = scmp.ne.s32.totalorder %s1251_s30, 0 }
 0x16f   : > { %p1259_p10 = scmp.ge.s32.totalorder %s923_s20, 2  ;;  %s527_s14 = scalar_lea.sflag [#allocation4], %s526_s9 }
 0x171   : > { %p684_p9 = pnand %p1259_p10, %p1258_p7 }
 0x173   : > { %898 = dma.done.wait (!%p684_p9), %s527_s14, 512  }
 0x174   : > { %900 = vsyncadd (!%p684_p9), %s527_s14, 4294966784  ;;  %s23_s20 = sadd.s32 1, %s923_s20   ;;  %s1260_s15 = smov %s907_s16 }
 0x175   : > { %p20_p11 = scmp.ge.s32.totalorder %s23_s20, 4   ;;  %s1261_s16 = smov %s911_s17 }
 0x176   : > { %s1262_s17 = smov %s1015_s29  ;;  %s1263_s18 = smov %s919_s19 }
 0x177   : > { %s1264_s19 = smov %s1266_s23  ;;  %22 = sbr.rel (!%p20_p11) target bundleno = 8 (0x8), region = 94 }
 0x17e   :  { %532 = vsyncpa [#allocation3], 1 }
 0x17f   :  { %534 = vsyncpa [#allocation3 + $0x1], 1 }
 0x180   :  { %535 = vsyncpa [#allocation6], 1 }
 0x181   :  { %537 = vsyncpa [#allocation6 + $0x1], 1 }
 0x182   :  { %538 = vsyncpa [#allocation4], 1 }
 0x183   :  { %540 = vsyncpa [#allocation4 + $0x1], 1 }

</bundles_post_ra>
